<compile_context>
chip_gen: v7x
topology: tpu7x:2x2x1
jax: 0.10.0
libtpu: 0.0.40
codegen_flags: <defaults>
</compile_context>

<pallas_src>
import jax
import jax.numpy as jnp
import numpy as np
from jax.experimental import pallas as pl
from jax.experimental.pallas import tpu as pltpu


def _fe_kernel(p_ref, w_ref, b_ref, o_ref):
    """Fused conv-as-matmul + bias + sigmoid.

    p_ref: (KKCp, TILE)  im2col patches (transposed); lane-dense columns
    w_ref: (C,    KKCp)  weights, rows = output channels (VMEM-resident)
    b_ref: (C, 1)        bias (VMEM-resident)
    o_ref: (C, TILE)     output block (lane-dense last dim)
    """
    acc = jnp.dot(w_ref[...], p_ref[...], preferred_element_type=jnp.float32)
    acc = acc + b_ref[...].astype(jnp.float32)
    o_ref[...] = jax.nn.sigmoid(acc).astype(o_ref.dtype)


def feature_extraction(x_nchw, weight, bias, k_size):
    """Pallas implementation of FeatureExtraction.forward.

    x_nchw : (N, C, H, W) float32
    weight : (C_out, C_in, K, K)  (PyTorch Conv2d layout), C_out == C_in == C
    bias   : (C,)
    """
    N, C, H, W = x_nchw.shape
    K = k_size
    assert K % 2 == 1, "same-padding via (K-1)//2 requires odd kernel size"
    assert weight.shape == (C, C, K, K)
    pad = (K - 1) // 2

    # ---- plain-JAX layout plumbing: pad, im2col (transposed), weight reshuffle ----
    x_nhwc = jnp.transpose(x_nchw, (0, 2, 3, 1))                        # (N,H,W,C)
    x_pad = jnp.pad(x_nhwc, ((0, 0), (pad, pad), (pad, pad), (0, 0)))

    # Pt[kh*K*C + kw*C + ci, n*H*W + h*W + w] = x_pad[n, h+kh, w+kw, ci]
    slabs = [x_pad[:, kh:kh + H, kw:kw + W, :]                          # (N,H,W,C)
             for kh in range(K) for kw in range(K)]
    pt = jnp.stack(slabs, axis=0)                                       # (K*K,N,H,W,C)
    pt = jnp.transpose(pt, (0, 4, 1, 2, 3)).reshape(K * K * C, N * H * W)

    # w2d[co, kh*K*C + kw*C + ci] = weight[co, ci, kh, kw]
    w2d = jnp.transpose(weight, (0, 2, 3, 1)).reshape(C, K * K * C)

    # Pad contraction dim to a multiple of 8 (sublane alignment).
    kkc = K * K * C
    kkc_p = ((kkc + 7) // 8) * 8
    if kkc_p != kkc:
        pt = jnp.pad(pt, ((0, kkc_p - kkc), (0, 0)))
        w2d = jnp.pad(w2d, ((0, 0), (0, kkc_p - kkc)))

    b2d = bias.reshape(C, 1)

    total = N * H * W
    # Column tiling: lane-aligned (multiple of 128); >= 2 parallel tiles when the
    # shape allows it so v7x's two TensorCores both get work; cap per-tile patch
    # bytes so the double-buffered block stays well inside VMEM on all
    # generations.
    LANE = 128
    if total % (2 * LANE) == 0:
        num_tiles, tile = 2, total // 2
        while tile % (2 * LANE) == 0 and tile * kkc_p * 4 > (4 << 20):
            num_tiles *= 2
            tile //= 2
    else:
        num_tiles, tile = 1, total

    out_flat = pl.pallas_call(
        _fe_kernel,
        out_shape=jax.ShapeDtypeStruct((C, total), x_nchw.dtype),
        grid_spec=pltpu.PrefetchScalarGridSpec(
            num_scalar_prefetch=0,
            grid=(num_tiles,),
            in_specs=[
                pl.BlockSpec((kkc_p, tile), lambda t: (0, t)),   # patches: tiled cols
                pl.BlockSpec((C, kkc_p), lambda t: (0, 0)),      # weights: resident
                pl.BlockSpec((C, 1), lambda t: (0, 0)),          # bias: resident
            ],
            out_specs=pl.BlockSpec((C, tile), lambda t: (0, t)),
        ),
        compiler_params=pltpu.CompilerParams(
            dimension_semantics=("parallel",)),
    )(pt, w2d, b2d)

    # (C, N*H*W) -> (N, C, H, W)
    return jnp.transpose(out_flat.reshape(C, N, H, W), (1, 0, 2, 3))


def _reference(x_nchw, weight, bias, k_size):
    """Pure-JAX reference (matches torch.nn.Conv2d + sigmoid)."""
    pad = (k_size - 1) // 2
    y = jax.lax.conv_general_dilated(
        x_nchw, weight,
        window_strides=(1, 1),
        padding=((pad, pad), (pad, pad)),
        dimension_numbers=("NCHW", "OIHW", "NCHW"),
    )
    y = y + bias.reshape(1, -1, 1, 1)
    return jax.nn.sigmoid(y)


if __name__ == "__main__":
    key = jax.random.PRNGKey(0)
    k_x, k_w, k_b = jax.random.split(key, 3)

    N, C, H, W = 2, 4, 16, 16
    K = 3

    x = jax.random.normal(k_x, (N, C, H, W), dtype=jnp.float32)
    # PyTorch-style uniform init bound 1/sqrt(fan_in).
    bound = 1.0 / np.sqrt(C * K * K)
    weight = jax.random.uniform(k_w, (C, C, K, K), jnp.float32, -bound, bound)
    bias = jax.random.uniform(k_b, (C,), jnp.float32, -bound, bound)

    out = feature_extraction(x, weight, bias, K)
    out = jax.block_until_ready(out)

    ref = jax.block_until_ready(_reference(x, weight, bias, K))
    assert out.shape == (N, C, H, W)
    assert np.allclose(np.asarray(out), np.asarray(ref), atol=1e-5, rtol=1e-5)

    print("KERNEL_OK")
</pallas_src>

<mosaic_0001>
module attributes {stable_mosaic.version = 11 : i64} {
  func.func @_fe_kernel(%arg0: i32, %arg1: memref<40x256xf32, #tpu.memory_space<vmem>>, %arg2: memref<4x40xf32, #tpu.memory_space<vmem>>, %arg3: memref<4x1xf32, #tpu.memory_space<vmem>>, %arg4: memref<4x256xf32, #tpu.memory_space<vmem>>) attributes {dimension_semantics = [#tpu.dimension_semantics<parallel>], iteration_bounds = array<i64: 2>, scalar_prefetch = 0 : i64, scratch_operands = 0 : i64, tpu.core_type = #tpu.core_type<tc>, window_params = [{transform_indices = @transform_0, window_bounds = array<i64: 40, 256>}, {pipeline_mode = #tpu.pipeline_mode<synchronous>, transform_indices = @transform_1, window_bounds = array<i64: 4, 40>}, {pipeline_mode = #tpu.pipeline_mode<synchronous>, transform_indices = @transform_2, window_bounds = array<i64: 4, 1>}, {transform_indices = @transform_3, window_bounds = array<i64: 4, 256>}]} {
    %c0 = arith.constant 0 : index
    %c0_0 = arith.constant 0 : index
    %0 = vector.load %arg2[%c0, %c0_0] : memref<4x40xf32, #tpu.memory_space<vmem>>, vector<4x40xf32>
    %c0_1 = arith.constant 0 : index
    %c0_2 = arith.constant 0 : index
    %1 = vector.load %arg1[%c0_1, %c0_2] : memref<40x256xf32, #tpu.memory_space<vmem>>, vector<40x256xf32>
    %cst = arith.constant dense<0.000000e+00> : vector<4x256xf32>
    %2 = tpu.matmul %0, %1, %cst {dimension_numbers = #tpu.dot_dimension_numbers<[1], [0], [0], [1], [0, 0, 1, 1], [], []>} : vector<4x40xf32>, vector<40x256xf32>, vector<4x256xf32> -> vector<4x256xf32>
    %c0_3 = arith.constant 0 : index
    %c0_4 = arith.constant 0 : index
    %3 = vector.load %arg3[%c0_3, %c0_4] : memref<4x1xf32, #tpu.memory_space<vmem>>, vector<4x1xf32>
    %4 = vector.broadcast %3 : vector<4x1xf32> to vector<4x256xf32>
    %5 = arith.addf %2, %4 : vector<4x256xf32>
    %6 = arith.negf %5 : vector<4x256xf32>
    %7 = math.exp %6 : vector<4x256xf32>
    %cst_5 = arith.constant 1.000000e+00 : f32
    %8 = vector.broadcast %cst_5 : f32 to vector<4x256xf32>
    %9 = arith.addf %8, %7 : vector<4x256xf32>
    %10 = arith.divf %8, %9 : vector<4x256xf32>
    %c0_6 = arith.constant 0 : index
    %c0_7 = arith.constant 0 : index
    %11 = vector.load %arg4[%c0_6, %c0_7] : memref<4x256xf32, #tpu.memory_space<vmem>>, vector<4x256xf32>
    tpu.vector_store %arg4[%c0_6, %c0_7], %10 {strides = array<i32>} : memref<4x256xf32, #tpu.memory_space<vmem>>, vector<4x256xf32>,
    return
  }
  func.func @transform_0(%arg0: i32) -> (i32, i32) {
    %c0_i32 = arith.constant 0 : i32
    %c0_i32_0 = arith.constant 0 : i32
    return %c0_i32, %arg0 : i32, i32
  }
  func.func @transform_1(%arg0: i32) -> (i32, i32) {
    %c0_i32 = arith.constant 0 : i32
    %c0_i32_0 = arith.constant 0 : i32
    %c0_i32_1 = arith.constant 0 : i32
    return %c0_i32, %c0_i32_0 : i32, i32
  }
  func.func @transform_2(%arg0: i32) -> (i32, i32) {
    %c0_i32 = arith.constant 0 : i32
    %c0_i32_0 = arith.constant 0 : i32
    %c0_i32_1 = arith.constant 0 : i32
    return %c0_i32, %c0_i32_0 : i32, i32
  }
  func.func @transform_3(%arg0: i32) -> (i32, i32) {
    %c0_i32 = arith.constant 0 : i32
    %c0_i32_0 = arith.constant 0 : i32
    return %c0_i32, %arg0 : i32, i32
  }
}

</mosaic_0001>

<bundles_post_ra>
// kernel: tpu_custom_call.1
= control target key start
LH: loop header
LB: loop body
LE: loop exit
PB: predicated region body
PF: predicated region fallthrough
CT: control target
= control target key end

     0   :  { %8 = vsyncpa [#allocation3], 0  ;;  %s760_s0 = inlined_call_operand.hbm [shape: f32[40,512], index: 0, kind: input, shape index: {}]   ;;  %s761_s1 = inlined_call_operand.vmem [shape: f32[4,40], index: 1, kind: input, shape index: {}]   ;;  %s762_s2 = inlined_call_operand.vmem [shape: f32[4,1], index: 2, kind: input, shape index: {}]   ;;  %s763_s3 = inlined_call_operand.hbm [shape: f32[4,512], index: 3, kind: output, shape index: {}]  }
   0x1   :  { %10 = vsyncpa [#allocation3 + $0x1], 0 }
   0x2   :  { %11 = vsyncpa [#allocation4], 0 }
   0x3   :  { %13 = vsyncpa [#allocation4 + $0x1], 0  ;;  %s597_s12 = smov 0   ;;  %s599_s13 = smov 0  }
   0x4   :  { %s601_s14 = smov 0   ;;  %s603_s15 = smov 0  }
   0x5 LB: > { %s618_s16 = sadd.s32 4294967295, %s568_s15   ;;  %s385_s17 = sadd.s32 4294967294, %s568_s15   ;;  %s568_s15 = sphi %s603_s15, %s776_s15   ;;  %s564_s14 = sphi %s601_s14, %s775_s14   ;;  %s560_s13 = sphi %s599_s13, %s774_s13   ;;  %s556_s12 = sphi %s597_s12, %s773_s12  }
   0x6   : > { %s622_s18 = sadd.s32 1, %s568_s15   ;;  %s26_s19 = sadd.s32 1, %s564_s14 }
   0x7   : > { %s23_s20 = ssub.s32 %s568_s15, %s622_s18  ;;  %p33_p0 = scmp.ne.s32.totalorder %s564_s14, %s560_s13 }
   0x8   : > { %p24_p1 = scmp.eq.s32.totalorder %s23_s20, 0  ;;  %p34_p2 = scmp.eq.s32.totalorder %s568_s15, 0 }
   0x9   : > { %p39_p3 = scmp.ne.s32.totalorder %s560_s13, %s556_s12  ;;  %p40_p4 = scmp.eq.s32.totalorder %s618_s16, 0 }
   0xa   : > { %s634_s21 = scalar_select %p24_p1, %s564_s14, %s26_s19  }
   0xb   : > { %p35_p5 = por %p34_p2, %p33_p0  ;;  %p636_p6 = por %p40_p4, %p39_p3 }
   0xc   : > { %p105_p7 = scmp.eq.s32.totalorder %s618_s16, 1  ;;  %p111_p8 = scmp.eq.s32.totalorder %s385_s17, 1 }
   0xd   : > { %p424_p10 = scmp.lt.s32.totalorder %s568_s15, 2  ;;  %s137_s25 = sand.u32 1, %s564_s14  }
   0xe   : > { %p643_p11 = por %p105_p7, %p33_p0  ;;  %p647_p12 = por %p111_p8, %p39_p3 }
   0xf   : > { %s400_s26 = sshll.u32 %s568_s15, 8  ;;  %s410_s27 = smul.u32 80, %s137_s25 }
  0x10   : > { %s766_s23 = scalar_select %p643_p11, 1, 0 }
  0x11   : > { %s767_s24 = scalar_select %p647_p12, 1, 0 }
  0x12   : > { %s656_s30 = scalar_lea.hbm %s760_s0, %s400_s26  ;;  %p658_p13 = pnand %p424_p10, %p35_p5 }
  0x13   : > { %s141_s5 = scalar_lea.vmem [#allocation2], %s410_s27  ;;  %s665_s7 = scalar_lea.sflag [#allocation3], %s137_s25 }
  0x14   : > { %s148_s6 = sshll.u32 %s141_s5, 4  ;;  %s472_s8 = scalar_lea.hbm %s656_s30, 1280  ;;  %s662_s6 = int_to_ptr.vmem [resolvable:$true] %s148_s6 }
  0x15   : > { %p473_p1 = scmp.ne.s32.totalorder %s656_s30, %s472_s8  ;;  %p474_p2 = pneg %p658_p13 }
  0x16   : > { %s477_s11 = scalar_lea.hbm %s760_s0, 2560  ;;  %p478_p5 = scmp.lt.u32.totalorder %s656_s30, %s760_s0 }
  0x17   : > { %p475_p3 = pnand %p474_p2, %p473_p1  ;;  %p479_p7 = scmp.lt.u32.totalorder %s477_s11, %s472_s8 }
  0x18   : > { %p481_p10 = scmp.lt.u32.totalorder %s472_s8, %s656_s30 }
  0x19   : > { %p476_p4 = pneg %p475_p3  ;;  %p480_p8 = por %p479_p7, %p478_p5 }
  0x1b   : > { %p482_p9 = por %p481_p10, %p480_p8 }
  0x1d   : > { %p483_p0 = pnand %p482_p9, %p476_p4 }
  0x1f   : > { %486 = shalt.err (!%p483_p0)
}
  0x20   : > { %s487_s20 = scalar_lea.vmem %s662_s6, 1280  ;;  %s570_s25 = smov [#allocation2]  }
  0x21   : > { %p488_p1 = scmp.ne.s32.totalorder %s662_s6, %s487_s20  ;;  %s492_s26 = sshll.u32 %s570_s25, 4  ;;  %s493_s26 = int_to_ptr.vmem [resolvable:$false] %s492_s26 }
  0x22   : > { %s494_s27 = scalar_lea.vmem %s493_s26, 2560  ;;  %p495_p11 = scmp.lt.s32.totalorder %s662_s6, %s493_s26 }
  0x23   : > { %p490_p3 = pnand %p488_p1, %p474_p2  ;;  %p496_p5 = scmp.lt.s32.totalorder %s494_s27, %s487_s20 }
  0x25   : > { %p491_p12 = pneg %p490_p3  ;;  %p497_p7 = por %p496_p5, %p495_p11 }
  0x27   : > { %p498_p8 = pnand %p497_p7, %p491_p12 }
  0x29   : > { %501 = shalt.err (!%p498_p8)
}
  0x2a   : > { %s571_s28 = smov 512   ;;  %s572_s29 = smov 256  }
  0x2b   : > { %s573_s5 = smov 16   ;;  %p156_p9 = scmp.lt.s32.totalorder %s568_s15, 3 }
  0x2c   : > { %419 = dma.hbm_to_vmem [thread:$0]  (!%p658_p13), %s656_s30, 1280, %s662_s6, %s665_s7, %s571_s28, %s572_s29, %s573_s5  }
  0x2d   : > { %p769_p0 = scmp.ge.s32.totalorder %s568_s15, 1 }
  0x2f   : > { %p157_p2 = pnand %p769_p0, %p156_p9 }
  0x30   : > { %s697_s8 = sand.u32 (!%p157_p2), 1, %s560_s13  }
  0x31   : > { %160 = sbr.rel (%p157_p2) target bundleno = 327 (0x147), region = 32  ;;  %s163_s10 = scalar_lea.sflag (!%p157_p2), [#allocation3], %s697_s8 }
  0x32   : > { %s411_s9 = smul.u32 (!%p157_p2), 80, %s697_s8 }
  0x34   : > { %s166_s11 = scalar_lea.vmem (!%p157_p2), [#allocation2], %s411_s9 }
  0x38   : > { %547 = dma.done.wait (%p636_p6), %s163_s10, 1280  }
  0x39   : > { %549 = vsyncadd (%p636_p6), %s163_s10, 4294966016  ;;  %v574_v0 = vmov 0.0   ;;  %v575_v1 = vmov 0   ;;  %v193_v2 = vld [vmem:[%s166_s11 + $0x8] sm:$0xff]  ;;  %v195_v3 = vld [vmem:[%s166_s11 + $0x18] sm:$0xff]  ;;  %vm208_vm0 = vcmask 326656  }
  0x3a   : > { %276 = vmatprep.mubr.f32.mxu0 %v574_v0  ;;  %463 = vset.pattern.permute.xlu0 %v575_v1  ;;  %v192_v4 = vld [vmem:[%s166_s11] sm:$0xff]  ;;  %v402_v5 = vpack.c.bf16 %v195_v3, %v193_v2  ;;  %v194_v6 = vld [vmem:[%s166_s11 + $0x10] sm:$0xff]  ;;  %v197_v7 = vld [vmem:[%s166_s11 + $0x28] sm:$0xff]  ;;  %s391_s7 = sshll.u32 %s697_s8, 3  ;;  %s401_s17 = sshll.u32 %s618_s16, 7 }
  0x3b   : > { %v199_v8 = vld [vmem:[%s166_s11 + $0x38] sm:$0xff]  ;;  %v404_v9 = vpack.c.bf16 %v194_v6, %v192_v4  ;;  %v196_v11 = vld [vmem:[%s166_s11 + $0x20] sm:$0xff]  ;;  %v198_v12 = vld [vmem:[%s166_s11 + $0x30] sm:$0xff]  ;;  %s188_s19 = scalar_lea.vmem [#allocation5], %s391_s7  ;;  %s716_s27 = scalar_lea.hbm %s763_s3, %s401_s17 }
  0x3c   : > { %v406_v10 = vpack.c.bf16 %v199_v8, %v197_v7  ;;  %403 = vmatprep.subr.bf16.mxu0 %v402_v5  ;;  %v202_v13 = vld [vmem:[%s762_s2] sm:$0xf]  ;;  %v408_v14 = vpack.c.bf16 %v198_v12, %v196_v11  ;;  %v201_v15 = vld [vmem:[%s166_s11 + $0x48] sm:$0xff]  ;;  %s315_s20 = sshll.u32 %s188_s19, 4  ;;  %s301_s28 = scalar_lea.sflag [#allocation4], %s697_s8  ;;  %s718_s20 = int_to_ptr.vmem [resolvable:$true] %s315_s20 }
  0x3d   : > { %405 = vmatpush1.bf16.msra.mxu0 %v404_v9  ;;  %205 = vperm.xlu0 %463, %v202_v13   ;;  %v200_v16 = vld [vmem:[%s166_s11 + $0x40] sm:$0xff]  ;;  %s502_s29 = scalar_lea.vmem %s718_s20, 128  ;;  %p770_p11 = scmp.ne.s32.totalorder %s766_s23, 0 }
  0x3e   : > { %407 = vmatprep.subr.bf16.mxu0 %v406_v10  ;;  %v191_v17 = vld [vmem:[%s761_s1] sm:$0xf]  ;;  %p503_p6 = scmp.ne.s32.totalorder %s718_s20, %s502_s29  ;;  %s576_s16 = smov [#allocation5]  }
  0x3f   : > { %s506_s5 = sshll.u32 %s576_s16, 4  ;;  %s507_s5 = int_to_ptr.vmem [resolvable:$false] %s506_s5 }
  0x40   : > { %p504_p12 = pnand %p503_p6, %p770_p11  ;;  %s508_s9 = scalar_lea.vmem %s507_s5, 256 }
  0x41   : > { %409 = vmatpush1.bf16.msra.mxu0 %v408_v14  ;;  %p509_p4 = scmp.lt.s32.totalorder %s718_s20, %s507_s5  ;;  %p510_p10 = scmp.lt.s32.totalorder %s508_s9, %s502_s29 }
  0x42   : > { %220 = vmatprep.subr.mxu0 %v201_v15  ;;  %p505_p13 = pneg %p504_p12 }
  0x43   : > { %p511_p1 = por %p510_p10, %p509_p4 }
  0x45   : > { %221 = vmatpush1.msra.mxu0 %v200_v16  ;;  %p512_p3 = pnand %p511_p1, %p505_p13 }
  0x46   : > { %392 = vmatmul.mubr.msk.f32.vlgmr.msra.gmra.mrb[0].mxu0 %vm208_vm0, %v191_v17 }
  0xbc   : > { %v206_v18 = vpop.permute.xlu0 %205 }
 0x119   : > { %v278_v19 = vpop.f32.mrb[0].mxu0 }
 0x11a   : > { %v279_v20 = vadd.f32 %v278_v19, %v206_v18  ;;  %v280_v21 = vpop.f32.mrb[1].mxu0 }
 0x11b   : > { %v281_v22 = vadd.f32 %v280_v21, %v206_v18 }
 0x11c   : > { %v393_v23 = vmul.f32 -1.442695, %v279_v20 }
 0x11d   : > { %v394_v24 = vmul.f32 -1.442695, %v281_v22 }
 0x11e   : > { %464 = vpow2.f32 %v393_v23 }
 0x11f   : > { %466 = vpow2.f32 %v394_v24 }
 0x128   : > { %v465_v25 = vpop.eup %464 }
 0x129   : > { %v467_v26 = vpop.eup %466  ;;  %v289_v27 = vadd.f32 1.0, %v465_v25 }
 0x12a   : > { %v290_v28 = vadd.f32 1.0, %v467_v26 }
 0x12b   : > { %468 = vrcp.f32 %v289_v27 }
 0x12c   : > { %470 = vrcp.f32 %v290_v28 }
 0x135   : > { %v469_v29 = vpop.eup %468 }
 0x136   : > { %v471_v30 = vpop.eup %470 }
 0x137   : > { %v297_v31 = vcombine.low %v469_v29, %v471_v30 }
 0x139   : > { %299 = vst [vmem:[%s188_s19] sm:$0xff] %v297_v31 }
 0x13a   : > { %515 = shalt.err (!%p512_p3)
}
 0x13b   : > { %s516_s8 = scalar_lea.hbm %s716_s27, 128  ;;  %s520_s30 = scalar_lea.hbm %s763_s3, 256 }
 0x13c   : > { %p517_p5 = scmp.ne.s32.totalorder %s716_s27, %s516_s8  ;;  %p521_p9 = scmp.lt.u32.totalorder %s716_s27, %s763_s3 }
 0x13d   : > { %p522_p0 = scmp.lt.u32.totalorder %s520_s30, %s516_s8  ;;  %p524_p6 = scmp.lt.u32.totalorder %s516_s8, %s716_s27 }
 0x13e   : > { %p518_p7 = pnand %p517_p5, %p770_p11 }
 0x13f   : > { %p523_p2 = por %p522_p0, %p521_p9 }
 0x140   : > { %p519_p8 = pneg %p518_p7 }
 0x141   : > { %p525_p12 = por %p524_p6, %p523_p2 }
 0x143   : > { %p526_p13 = pnand %p525_p12, %p519_p8 }
 0x145   : > { %529 = shalt.err (!%p526_p13)
}
 0x146   : > { %414 = dma.vmem_to_hbm [thread:$0]  (%p770_p11), %s718_s20, 128, %s716_s27, %s301_s28  }
 0x147 PF: > { %s327_s6 = sand.u32 1, %s556_s12   ;;  %p771_p4 = scmp.ne.s32.totalorder %s767_s24, 0 }
 0x148   : > { %p772_p10 = scmp.ge.s32.totalorder %s568_s15, 2  ;;  %s328_s7 = scalar_lea.sflag [#allocation4], %s327_s6 }
 0x14a   : > { %p421_p1 = pnand %p772_p10, %p771_p4 }
 0x14c   : > { %551 = dma.done.wait (!%p421_p1), %s328_s7, 128  }
 0x14d   : > { %553 = vsyncadd (!%p421_p1), %s328_s7, 4294967168  ;;  %p16_p3 = scmp.ge.s32.totalorder %s622_s18, 4   ;;  %s773_s12 = smov %s560_s13 }
 0x14e   : > { %s774_s13 = smov %s564_s14  ;;  %s775_s14 = smov %s634_s21 }
 0x14f   : > { %s776_s15 = smov %s622_s18  ;;  %18 = sbr.rel (!%p16_p3) target bundleno = 5 (0x5), region = 77 }
 0x156   :  { %333 = vsyncpa [#allocation3], 1 }
 0x157   :  { %335 = vsyncpa [#allocation3 + $0x1], 1 }
 0x158   :  { %336 = vsyncpa [#allocation4], 1 }
 0x159   :  { %338 = vsyncpa [#allocation4 + $0x1], 1 }

</bundles_post_ra>
